<compile_context>
chip_gen: v7x
topology: tpu7x:2x2x1
jax: 0.10.0
libtpu: 0.0.40
codegen_flags: <defaults>
</compile_context>

<pallas_src>
import functools

import jax
import jax.numpy as jnp
from jax.experimental import pallas as pl
from jax.experimental.pallas import tpu as pltpu

cfgs = {
    "A": [64, "M", 128, "M", 256, 256, "M", 512, 512, "M", 512, 512, "M"],
    "B": [64, 64, "M", 128, "M", 128, "M", 256, 256, "M", 512, 512, "M", 512, 512, "M"],
    "D": [64, 64, "M", 128, 128, "M", 256, 256, 256, "M", 512, 512, 512, "M", 512, 512, 512, "M"],
    "E": [64, 64, "M", 128, 128, "M", 256, 256, 256, 256, "M", 512, 512, 512, 512, "M",
          512, 512, 512, 512, "M"],
}

_VMEM_LIMIT_BYTES = 48 * 1024 * 1024  # <= v7x's 64 MiB with pipelining headroom


def _round_up(x, m):
    return (x + m - 1) // m * m


def _pick_tk(kp, max_tk=1024):
    """Largest multiple of 128 that divides kp (kp is a multiple of 128) and <= max_tk."""
    if kp <= max_tk:
        return kp
    best = 128
    t = 256
    while t <= max_tk:
        if kp % t == 0:
            best = t
        t += 128
    return best


# ---------------------------------------------------------------------------
# Pallas kernel: tiled matmul (bf16 in, f32 accumulate) with fused bias + ReLU.
# Grid = (M/tm, N/tn, K/tk); K is the innermost (reduction, "arbitrary") axis.
# ---------------------------------------------------------------------------
def _matmul_bias_act_kernel(x_ref, w_ref, b_ref, o_ref, acc_ref, *, apply_relu):
    k = pl.program_id(2)

    @pl.when(k == 0)
    def _init():
        acc_ref[...] = jnp.zeros_like(acc_ref)

    acc_ref[...] += jnp.dot(
        x_ref[...], w_ref[...], preferred_element_type=jnp.float32
    )

    @pl.when(k == pl.num_programs(2) - 1)
    def _finish():
        out = acc_ref[...] + b_ref[...]  # (tm,tn) + (1,tn) broadcast, f32
        if apply_relu:
            out = jnp.maximum(out, 0.0)
        o_ref[...] = out.astype(o_ref.dtype)


def matmul_bias_act(x, w, b, *, apply_relu, out_dtype=jnp.bfloat16):
    """y = relu?(x @ w + b). x:(M,K), w:(K,N) -> bf16 operands, f32 accumulation."""
    M, K = x.shape
    K2, N = w.shape
    assert K == K2

    x = x.astype(jnp.bfloat16)
    w = w.astype(jnp.bfloat16)
    b = b.astype(jnp.float32)

    # Tile selection: bf16 min sublane tile is 16, lanes 128.  K is padded only
    # to the next multiple of 128 and tk is chosen to divide Kp exactly.
    tm = min(512, _round_up(M, 16))
    tn = min(512, _round_up(N, 128))
    Kp = _round_up(K, 128)
    tk = _pick_tk(Kp, 1024)
    Mp, Np = _round_up(M, tm), _round_up(N, tn)

    xp = x if (Mp == M and Kp == K) else jnp.pad(x, ((0, Mp - M), (0, Kp - K)))
    wp = w if (Kp == K and Np == N) else jnp.pad(w, ((0, Kp - K), (0, Np - N)))
    bp = jnp.pad(b, ((0, Np - N),)).reshape(1, Np)

    w_index_map = lambda i, j, k: (k, j)
    # Classifier layers at tiny batch are pure weight-DMA streams: request
    # deeper pipelining on the weight BlockSpec (helps most on v7x).
    if Mp <= 64:
        try:
            w_spec = pl.BlockSpec((tk, tn), w_index_map, pipeline_mode=pl.Buffered(3))
        except (TypeError, AttributeError):
            w_spec = pl.BlockSpec((tk, tn), w_index_map)
    else:
        w_spec = pl.BlockSpec((tk, tn), w_index_map)

    out = pl.pallas_call(
        functools.partial(_matmul_bias_act_kernel, apply_relu=apply_relu),
        out_shape=jax.ShapeDtypeStruct((Mp, Np), out_dtype),
        grid=(Mp // tm, Np // tn, Kp // tk),
        in_specs=[
            pl.BlockSpec((tm, tk), lambda i, j, k: (i, k)),
            w_spec,
            pl.BlockSpec((1, tn), lambda i, j, k: (0, j)),
        ],
        out_specs=pl.BlockSpec((tm, tn), lambda i, j, k: (i, j)),
        scratch_shapes=[pltpu.VMEM((tm, tn), jnp.float32)],
        compiler_params=pltpu.CompilerParams(
            dimension_semantics=("parallel", "parallel", "arbitrary"),
            vmem_limit_bytes=_VMEM_LIMIT_BYTES,
        ),
    )(xp, wp, bp)
    return out[:M, :N]


# ---------------------------------------------------------------------------
# Pallas kernel: 2x2 max-pool.  Input is a pure row-view reshape
# (N*H2, 2*W*C) — no strided tap copies in HBM.  The vertical max is an
# aligned lane-slice; the horizontal max pairs adjacent C-chunks in-register.
# Output blocks are lane-dense (last dim W2*C, a multiple of 128).
# ---------------------------------------------------------------------------
def _maxpool_kernel(x_ref, o_ref, *, w_in, c):
    row = x_ref[...]                       # (tr, 2 * w_in * c)
    half = w_in * c
    v = jnp.maximum(row[:, :half], row[:, half:])   # vertical max -> (tr, w_in*c)
    w2 = w_in // 2
    chunks = [
        jnp.maximum(v[:, (2 * k) * c:(2 * k + 1) * c],
                    v[:, (2 * k + 1) * c:(2 * k + 2) * c])
        for k in range(w2)
    ]
    o_ref[...] = chunks[0] if len(chunks) == 1 else jnp.concatenate(chunks, axis=-1)


def maxpool2x2(x):
    """x: (N, H, W, C) NHWC -> (N, H//2, W//2, C). Floors odd H/W like MaxPool2d(2,2)."""
    N, H, W, C = x.shape
    H2, W2 = H // 2, W // 2
    x = x[:, : 2 * H2, : 2 * W2, :]
    WW = 2 * W2
    R = N * H2
    xv = x.reshape(R, 2 * WW * C)          # pure contiguous reshape, no tap copies

    tr = R if R <= 256 else 256
    Rp = _round_up(R, tr)
    if Rp != R:
        xv = jnp.pad(xv, ((0, Rp - R), (0, 0)))

    out = pl.pallas_call(
        functools.partial(_maxpool_kernel, w_in=WW, c=C),
        out_shape=jax.ShapeDtypeStruct((Rp, W2 * C), x.dtype),
        grid=(Rp // tr,),
        in_specs=[pl.BlockSpec((tr, 2 * WW * C), lambda i: (i, 0))],
        out_specs=pl.BlockSpec((tr, W2 * C), lambda i: (i, 0)),
        compiler_params=pltpu.CompilerParams(
            dimension_semantics=("parallel",),
            vmem_limit_bytes=_VMEM_LIMIT_BYTES,
        ),
    )(xv)
    return out[:R].reshape(N, H2, W2, C)


# ---------------------------------------------------------------------------
# Conv 3x3 / pad 1 + bias + ReLU  (im2col glue + Pallas matmul kernel).
# TODO(synk): fuse the im2col into the matmul (manual DMA of shifted windows /
# tap-folded K axis) so the 9x patch array never hits HBM; patches are built
# in bf16 here to halve that traffic in the meantime.
# ---------------------------------------------------------------------------
def conv3x3_bias_relu(x, w, b):
    """x: (N,H,W,Cin) NHWC bf16; w: (3,3,Cin,Cout) bf16; b: (Cout,) f32."""
    N, H, W, Cin = x.shape
    Cout = w.shape[-1]
    xp = jnp.pad(x, ((0, 0), (1, 1), (1, 1), (0, 0)))
    cols = [xp[:, dy:dy + H, dx:dx + W, :] for dy in range(3) for dx in range(3)]
    patches = jnp.concatenate(cols, axis=-1).reshape(N * H * W, 9 * Cin)
    wmat = w.reshape(9 * Cin, Cout)  # same (dy, dx, cin) ordering as the patches
    y = matmul_bias_act(patches, wmat, b, apply_relu=True, out_dtype=jnp.bfloat16)
    return y.reshape(N, H, W, Cout)


# ---------------------------------------------------------------------------
# Adaptive average pool to (7, 7) — tiny reduction, done as plain-JAX glue
# with exact PyTorch AdaptiveAvgPool2d index semantics.
# ---------------------------------------------------------------------------
def adaptive_avg_pool_7x7(x):
    N, H, W, C = x.shape
    O = 7
    rows = []
    for i in range(O):
        h0, h1 = (i * H) // O, -(-((i + 1) * H) // O)
        cols = []
        for j in range(O):
            w0, w1 = (j * W) // O, -(-((j + 1) * W) // O)
            cols.append(jnp.mean(x[:, h0:h1, w0:w1, :], axis=(1, 2)))
        rows.append(jnp.stack(cols, axis=1))
    return jnp.stack(rows, axis=1)  # (N, 7, 7, C)


# ---------------------------------------------------------------------------
# Parameter init (matches the module's __init__ init schemes, deterministic).
# Weights are stored in bf16 (cast once at the model boundary), biases in f32.
# ---------------------------------------------------------------------------
def init_params(key, cfg_list, num_classes):
    params = {"features": [], "classifier": []}
    in_c = 3
    for v in cfg_list:
        if v == "M":
            params["features"].append({"type": "pool"})
        else:
            key, kw = jax.random.split(key)
            std = (2.0 / (v * 3 * 3)) ** 0.5  # kaiming_normal_, fan_out, relu
            w = (jax.random.normal(kw, (3, 3, in_c, v), jnp.float32) * std).astype(jnp.bfloat16)
            b = jnp.zeros((v,), jnp.float32)
            params["features"].append({"type": "conv", "w": w, "b": b})
            in_c = v
    for din, dout in [(512 * 7 * 7, 4096), (4096, 4096), (4096, num_classes)]:
        key, kw = jax.random.split(key)
        w = (jax.random.normal(kw, (din, dout), jnp.float32) * 0.01).astype(jnp.bfloat16)
        b = jnp.zeros((dout,), jnp.float32)
        params["classifier"].append((w, b))
    return params


# ---------------------------------------------------------------------------
# Full forward pass
# ---------------------------------------------------------------------------
def vggnet_forward(x_nchw, params):
    # Accept NCHW (PyTorch convention); compute in NHWC bf16 internally.
    x = jnp.transpose(x_nchw, (0, 2, 3, 1)).astype(jnp.bfloat16)

    for layer in params["features"]:
        if layer["type"] == "conv":
            x = conv3x3_bias_relu(x, layer["w"], layer["b"])
        else:
            x = maxpool2x2(x)

    x = adaptive_avg_pool_7x7(x)                       # (N, 7, 7, 512)
    x = jnp.transpose(x, (0, 3, 1, 2))                 # back to NCHW
    x = x.reshape(x.shape[0], -1)                      # torch.flatten(x, 1)

    (w1, b1), (w2, b2), (w3, b3) = params["classifier"]
    x = matmul_bias_act(x, w1, b1, apply_relu=True, out_dtype=jnp.bfloat16)
    # nn.Dropout: identity at inference time
    x = matmul_bias_act(x, w2, b2, apply_relu=True, out_dtype=jnp.bfloat16)
    # nn.Dropout: identity at inference time
    x = matmul_bias_act(x, w3, b3, apply_relu=False, out_dtype=jnp.float32)
    return x


if __name__ == "__main__":
    key = jax.random.PRNGKey(0)
    key, kx, kp = jax.random.split(key, 3)

    num_classes = 10
    params = init_params(kp, cfgs["A"], num_classes)   # VGG-11, batch_norm=False

    # Small input: batch=2, 3 channels, 32x32 spatial (NCHW, like PyTorch).
    x = jax.random.normal(kx, (2, 3, 32, 32), jnp.float32)

    out = vggnet_forward(x, params)
    out = jax.block_until_ready(out)
    assert out.shape == (2, num_classes), out.shape
    assert jnp.all(jnp.isfinite(out))
    print("KERNEL_OK")
</pallas_src>

<mosaic_0001>
module attributes {stable_mosaic.version = 11 : i64} {
  func.func @_matmul_bias_act_kernel(%arg0: i32, %arg1: i32, %arg2: i32, %arg3: memref<512x128xbf16, #tpu.memory_space<vmem>>, %arg4: memref<128x128xbf16, #tpu.memory_space<vmem>>, %arg5: memref<1x128xf32, #tpu.memory_space<vmem>>, %arg6: memref<512x128xbf16, #tpu.memory_space<vmem>>, %arg7: memref<512x128xf32, #tpu.memory_space<vmem>>) attributes {dimension_semantics = [#tpu.dimension_semantics<parallel>, #tpu.dimension_semantics<parallel>, #tpu.dimension_semantics<arbitrary>], iteration_bounds = array<i64: 4, 1, 1>, scalar_prefetch = 0 : i64, scratch_operands = 1 : i64, tpu.core_type = #tpu.core_type<tc>, window_params = [{transform_indices = @transform_0, window_bounds = array<i64: 512, 128>}, {transform_indices = @transform_1, window_bounds = array<i64: 128, 128>}, {transform_indices = @transform_2, window_bounds = array<i64: 1, 128>}, {transform_indices = @transform_3, window_bounds = array<i64: 512, 128>}]} {
    %c0_i32 = arith.constant 0 : i32
    %0 = arith.cmpi eq, %arg2, %c0_i32 : i32
    %1 = arith.extui %0 : i1 to i32
    %c0_i32_0 = arith.constant 0 : i32
    %2 = arith.cmpi ne, %1, %c0_i32_0 : i32
    scf.if %2 {
      %cst_10 = arith.constant 0.000000e+00 : f32
      %12 = vector.broadcast %cst_10 : f32 to vector<512x128xf32>
      %c0_11 = arith.constant 0 : index
      %c0_12 = arith.constant 0 : index
      %13 = vector.load %arg7[%c0_11, %c0_12] : memref<512x128xf32, #tpu.memory_space<vmem>>, vector<512x128xf32>
      tpu.vector_store %arg7[%c0_11, %c0_12], %12 {strides = array<i32>} : memref<512x128xf32, #tpu.memory_space<vmem>>, vector<512x128xf32>,
    } else {
    }
    %c0 = arith.constant 0 : index
    %c0_1 = arith.constant 0 : index
    %3 = vector.load %arg7[%c0, %c0_1] : memref<512x128xf32, #tpu.memory_space<vmem>>, vector<512x128xf32>
    %c0_2 = arith.constant 0 : index
    %c0_3 = arith.constant 0 : index
    %4 = vector.load %arg3[%c0_2, %c0_3] : memref<512x128xbf16, #tpu.memory_space<vmem>>, vector<512x128xbf16>
    %c0_4 = arith.constant 0 : index
    %c0_5 = arith.constant 0 : index
    %5 = vector.load %arg4[%c0_4, %c0_5] : memref<128x128xbf16, #tpu.memory_space<vmem>>, vector<128x128xbf16>
    %cst = arith.constant dense<0.000000e+00> : vector<512x128xf32>
    %6 = tpu.matmul %4, %5, %cst {dimension_numbers = #tpu.dot_dimension_numbers<[1], [0], [0], [1], [0, 0, 1, 1], [], []>} : vector<512x128xbf16>, vector<128x128xbf16>, vector<512x128xf32> -> vector<512x128xf32>
    %7 = arith.addf %3, %6 : vector<512x128xf32>
    %c0_6 = arith.constant 0 : index
    %c0_7 = arith.constant 0 : index
    %8 = vector.load %arg7[%c0_6, %c0_7] : memref<512x128xf32, #tpu.memory_space<vmem>>, vector<512x128xf32>
    tpu.vector_store %arg7[%c0_6, %c0_7], %7 {strides = array<i32>} : memref<512x128xf32, #tpu.memory_space<vmem>>, vector<512x128xf32>,
    %c0_i32_8 = arith.constant 0 : i32
    %9 = arith.cmpi eq, %arg2, %c0_i32_8 : i32
    %10 = arith.extui %9 : i1 to i32
    %c0_i32_9 = arith.constant 0 : i32
    %11 = arith.cmpi ne, %10, %c0_i32_9 : i32
    scf.if %11 {
      %c0_10 = arith.constant 0 : index
      %c0_11 = arith.constant 0 : index
      %12 = vector.load %arg7[%c0_10, %c0_11] : memref<512x128xf32, #tpu.memory_space<vmem>>, vector<512x128xf32>
      %c0_12 = arith.constant 0 : index
      %c0_13 = arith.constant 0 : index
      %13 = vector.load %arg5[%c0_12, %c0_13] : memref<1x128xf32, #tpu.memory_space<vmem>>, vector<1x128xf32>
      %14 = vector.broadcast %13 : vector<1x128xf32> to vector<512x128xf32>
      %15 = arith.addf %12, %14 : vector<512x128xf32>
      %cst_14 = arith.constant 0.000000e+00 : f32
      %16 = vector.broadcast %cst_14 : f32 to vector<512x128xf32>
      %17 = arith.maximumf %15, %16 : vector<512x128xf32>
      %18 = arith.truncf %17 : vector<512x128xf32> to vector<512x128xbf16>
      %c0_15 = arith.constant 0 : index
      %c0_16 = arith.constant 0 : index
      %19 = vector.load %arg6[%c0_15, %c0_16] : memref<512x128xbf16, #tpu.memory_space<vmem>>, vector<512x128xbf16>
      tpu.vector_store %arg6[%c0_15, %c0_16], %18 {strides = array<i32>} : memref<512x128xbf16, #tpu.memory_space<vmem>>, vector<512x128xbf16>,
    } else {
    }
    return
  }
  func.func @transform_0(%arg0: i32, %arg1: i32, %arg2: i32) -> (i32, i32) {
    %c0_i32 = arith.constant 0 : i32
    return %arg0, %arg2 : i32, i32
  }
  func.func @transform_1(%arg0: i32, %arg1: i32, %arg2: i32) -> (i32, i32) {
    %c0_i32 = arith.constant 0 : i32
    return %arg2, %arg1 : i32, i32
  }
  func.func @transform_2(%arg0: i32, %arg1: i32, %arg2: i32) -> (i32, i32) {
    %c0_i32 = arith.constant 0 : i32
    %c0_i32_0 = arith.constant 0 : i32
    return %c0_i32, %arg1 : i32, i32
  }
  func.func @transform_3(%arg0: i32, %arg1: i32, %arg2: i32) -> (i32, i32) {
    %c0_i32 = arith.constant 0 : i32
    return %arg0, %arg1 : i32, i32
  }
}

</mosaic_0001>

<bundles_post_ra>
// kernel: tpu_custom_call.1
= control target key start
LH: loop header
LB: loop body
LE: loop exit
PB: predicated region body
PF: predicated region fallthrough
CT: control target
= control target key end

     0   :  { %8 = vsyncpa [#allocation4], 0  ;;  %s2948_s0 = inlined_call_operand.hbm [shape: bf16[2048,128], index: 0, kind: input, shape index: {}]   ;;  %s2949_s1 = inlined_call_operand.hbm [shape: bf16[128,128], index: 1, kind: input, shape index: {}]   ;;  %s2950_s2 = inlined_call_operand.vmem [shape: f32[1,128], index: 2, kind: input, shape index: {}]   ;;  %s2951_s3 = inlined_call_operand.hbm [shape: bf16[2048,128], index: 3, kind: output, shape index: {}]  }
   0x1   :  { %10 = vsyncpa [#allocation4 + $0x1], 0 }
   0x2   :  { %11 = vsyncpa [#allocation7], 0 }
   0x3   :  { %12 = vsyncpa [#allocation5], 0 }
   0x4   :  { %14 = vsyncpa [#allocation5 + $0x1], 0  ;;  %s2583_s12 = smov 0   ;;  %s2585_s13 = smov 0  }
   0x5   :  { %s2587_s14 = smov 0   ;;  %s2589_s15 = smov 0  }
   0x6   :  { %s2591_s16 = smov 0   ;;  %s2593_s17 = smov 0  }
   0x7 LB: > { %s1777_s18 = sadd.s32 4294967295, %s2554_s17   ;;  %s1778_s19 = sadd.s32 4294967294, %s2554_s17   ;;  %s2554_s17 = sphi %s2593_s17, %s20_s17   ;;  %s2550_s16 = sphi %s2591_s16, %s2974_s16   ;;  %s2546_s15 = sphi %s2589_s15, %s2973_s15   ;;  %s2542_s14 = sphi %s2587_s14, %s2972_s14   ;;  %s2538_s13 = sphi %s2585_s13, %s2971_s13   ;;  %s2534_s12 = sphi %s2583_s12, %s2970_s12  }
   0x8   : > { %p61_p0 = scmp.ne.s32.totalorder %s2538_s13, %s2534_s12  ;;  %p2617_p1 = scmp.eq.s32.totalorder %s1777_s18, 0 }
   0x9   : > { %p2621_p2 = scmp.eq.s32.totalorder %s1777_s18, 3  ;;  %p147_p3 = scmp.eq.s32.totalorder %s1778_s19, 3 }
   0xa   : > { %s2956_s20 = scalar_select %p2617_p1, 1, 0 }
   0xb   : > { %s2957_s21 = scalar_select %p2621_p2, 1, 0 }
   0xc   : > { %p2627_p4 = por %p2617_p1, %p61_p0  ;;  %p1779_p5 = scmp.ge.s32.totalorder %s2554_s17, 1 }
   0xd   : > { %p2632_p6 = por %p147_p3, %p61_p0  ;;  %p154_p7 = scmp.lt.s32.totalorder %s2554_s17, 5 }
   0xe   : > { %s2958_s22 = scalar_select %p2627_p4, 1, 0 }
   0xf   : > { %s2959_s23 = scalar_select %p2632_p6, 1, 0 }
  0x10   : > { %p2637_p8 = pnand %p1779_p5, %p154_p7  ;;  %s2556_s25 = smov [#allocation6]  }
  0x11   : > { %s170_s26 = sshll.u32 %s2556_s25, 4  ;;  %s39_s28 = sadd.s32 1, %s2550_s16  ;;  %s171_s26 = int_to_ptr.vmem [resolvable:$true] %s170_s26 }
  0x12   : > { %s2960_s24 = scalar_select %p2637_p8, 1, 0 }
  0x13   : > { %p2301_p9 = pneg %p2637_p8  ;;  %s2410_s4 = scalar_lea.hbm %s2949_s1, 1024 }
  0x14   : > { %p2411_p11 = scmp.ne.s32.totalorder %s2949_s1, %s2410_s4  ;;  %p2417_p3 = scmp.lt.u32.totalorder %s2410_s4, %s2949_s1 }
  0x15   : > { %p2645_p10 = pnand %p2301_p9, %p2617_p1 }
  0x17   : > { %p2412_p12 = pneg %p2645_p10 }
  0x19   : > { %p2413_p13 = pnand %p2412_p12, %p2411_p11 }
  0x1b   : > { %p2414_p0 = pneg %p2413_p13 }
  0x1d   : > { %p2419_p5 = pnand %p2417_p3, %p2414_p0 }
  0x1f   : > { %2422 = shalt.err (!%p2419_p5)
}
  0x20   : > { %s2423_s9 = scalar_lea.vmem %s171_s26, 1024  ;;  %p2431_p1 = scmp.lt.s32.totalorder %s171_s26, %s171_s26 }
  0x21   : > { %p2424_p7 = scmp.ne.s32.totalorder %s171_s26, %s2423_s9  ;;  %p2432_p4 = scmp.lt.s32.totalorder %s2423_s9, %s2423_s9 }
  0x23   : > { %p2426_p9 = pnand %p2424_p7, %p2412_p12  ;;  %p2433_p8 = por %p2432_p4, %p2431_p1 }
  0x25   : > { %p2427_p6 = pneg %p2426_p9 }
  0x27   : > { %p2434_p2 = pnand %p2433_p8, %p2427_p6 }
  0x29   : > { %2437 = shalt.err (!%p2434_p2)
}
  0x2a   : > { %s2557_s10 = smov 64   ;;  %s2558_s11 = smov 4  }
  0x2b   : > { %2304 = dma.hbm_to_vmem [thread:$0]  (!%p2645_p10), %s2949_s1, 1024, %s171_s26, [#allocation7], %s2557_s10, %s2557_s10, %s2558_s11  }
  0x2c   : > { %p41_p1 = scmp.ge.s32.totalorder %s39_s28, 4  ;;  %s48_s25 = sadd.s32 1, %s2542_s14 }
  0x2d   : > { %p55_p2 = scmp.ne.s32.totalorder %s2542_s14, %s2538_s13  ;;  %p56_p4 = scmp.eq.s32.totalorder %s2554_s17, 0 }
  0x2e   : > { %s2976_s28 = smov (%p41_p1, %s39_s28), 0  ;;  %p2963_p8 = scmp.ne.s32.totalorder %s2957_s21, 0 }
  0x2f   : > { %p2675_p6 = por %p56_p4, %p55_p2  ;;  %s43_s30 = ssub.s32 %s2550_s16, %s2976_s28 }
  0x30   : > { %p2681_p11 = por %p2963_p8, %p55_p2  ;;  %p2314_p12 = scmp.lt.s32.totalorder %s2554_s17, 4 }
  0x31   : > { %p46_p10 = scmp.eq.s32.totalorder %s43_s30, 0  ;;  %s190_s26 = sand.u32 1, %s2542_s14  }
  0x32   : > { %s1783_s4 = sshll.u32 %s190_s26, 8  ;;  %s1900_s6 = sshll.u32 %s2550_s16, 12 }
  0x33   : > { %s2690_s5 = scalar_select %p46_p10, %s2542_s14, %s48_s25  }
  0x34   : > { %s2696_s9 = scalar_lea.hbm %s2948_s0, %s1900_s6  ;;  %s194_s21 = scalar_lea.vmem [#allocation3], %s1783_s4 }
  0x35   : > { %s202_s18 = sshll.u32 %s194_s21, 4  ;;  %p2702_p13 = pnand %p2314_p12, %p2675_p6  ;;  %s2698_s18 = int_to_ptr.vmem [resolvable:$true] %s202_s18 }
  0x36   : > { %s2706_s25 = scalar_lea.sflag [#allocation4], %s190_s26  ;;  %s2438_s30 = scalar_lea.hbm %s2696_s9, 4096 }
  0x37   : > { %p2439_p0 = scmp.ne.s32.totalorder %s2696_s9, %s2438_s30  ;;  %p2440_p3 = pneg %p2702_p13 }
  0x38   : > { %s2443_s29 = scalar_lea.hbm %s2948_s0, 16384  ;;  %p2444_p9 = scmp.lt.u32.totalorder %s2696_s9, %s2948_s0 }
  0x39   : > { %p2441_p5 = pnand %p2440_p3, %p2439_p0  ;;  %p2445_p1 = scmp.lt.u32.totalorder %s2443_s29, %s2438_s30 }
  0x3a   : > { %p2447_p4 = scmp.lt.u32.totalorder %s2438_s30, %s2696_s9 }
  0x3b   : > { %p2442_p7 = pneg %p2441_p5  ;;  %p2446_p2 = por %p2445_p1, %p2444_p9 }
  0x3d   : > { %p2448_p6 = por %p2447_p4, %p2446_p2 }
  0x3f   : > { %p2449_p8 = pnand %p2448_p6, %p2442_p7 }
  0x41   : > { %2452 = shalt.err (!%p2449_p8)
}
  0x42   : > { %s2453_s26 = scalar_lea.vmem %s2698_s18, 4096  ;;  %s2559_s21 = smov [#allocation3]  }
  0x43   : > { %p2454_p12 = scmp.ne.s32.totalorder %s2698_s18, %s2453_s26  ;;  %s2458_s4 = sshll.u32 %s2559_s21, 4  ;;  %s2459_s4 = int_to_ptr.vmem [resolvable:$false] %s2458_s4 }
  0x44   : > { %s2460_s6 = scalar_lea.vmem %s2459_s4, 8192  ;;  %p2461_p5 = scmp.lt.s32.totalorder %s2698_s18, %s2459_s4 }
  0x45   : > { %p2456_p10 = pnand %p2454_p12, %p2440_p3  ;;  %p2462_p9 = scmp.lt.s32.totalorder %s2460_s6, %s2453_s26 }
  0x47   : > { %p2457_p0 = pneg %p2456_p10  ;;  %p2463_p1 = por %p2462_p9, %p2461_p5 }
  0x49   : > { %p2464_p2 = pnand %p2463_p1, %p2457_p0 }
  0x4b   : > { %2467 = shalt.err (!%p2464_p2)
}
  0x4c   : > { %2308 = dma.hbm_to_vmem [thread:$0]  (!%p2702_p13), %s2696_s9, 4096, %s2698_s18, %s2706_s25, %s2557_s10, %s2557_s10, %s2558_s11  }
  0x4d   : > { %p2966_p3 = scmp.ne.s32.totalorder %s2960_s24, 0 }
  0x4e   : > { %s2740_s30 = sand.u32 (!%p2966_p3), 1, %s2538_s13   ;;  %p2967_p7 = scmp.ne.s32.totalorder (!%p2966_p3), %s2958_s22, 0 }
  0x4f   : > { %214 = sbr.rel (%p2966_p3) target bundleno = 415 (0x19f), region = 32  ;;  %s1787_s29 = sshll.u32 (!%p2966_p3), %s2740_s30, 8 }
  0x50   : > { %s217_s7 = scalar_lea.sflag (!%p2966_p3), [#allocation4], %s2740_s30  ;;  %s2746_s19 = scalar_lea.vmem (!%p2966_p3), [#allocation3], %s1787_s29 }
  0x56   : > { %2521 = dma.done.wait (%p2967_p7), %s217_s7, 4096  }
  0x57   : > { %2523 = vsyncadd (%p2967_p7), %s217_s7, 4294963200  ;;  %p2968_p13 = scmp.ne.s32.totalorder %s2956_s20, 0 }
  0x59   : > { %2525 = dma.done.wait (%p2968_p13), [#allocation7], 1024  }
  0x5a   : > { %2527 = vsyncadd (%p2968_p13), [#allocation7], 4294966272  ;;  %v2370_v0 = vld [vmem:[#allocation6] sm:$0xff]   ;;  %v2371_v1 = vld [vmem:[#allocation6 + $0x8] sm:$0xff]   ;;  %s2803_s24 = scalar_lea.vmem [#allocation8], %s1787_s29  ;;  %s1965_s10 = sshll.u32 %s2546_s15, 12 }
  0x5b   : > { %2197 = vmatprep.subr.bf16.mxu0 %v2370_v0  ;;  %2277 = vmatprep.subr.bf16.mxu1 %v2370_v0  ;;  %v2372_v2 = vld [vmem:[#allocation6 + $0x10] sm:$0xff]   ;;  %v2373_v3 = vld [vmem:[#allocation6 + $0x18] sm:$0xff]   ;;  %v2378_v4 = vld [vmem:[%s2746_s19] sm:$0xff]   ;;  %s1663_s11 = sshll.u32 %s2803_s24, 4  ;;  %s2894_s15 = scalar_lea.hbm %s2951_s3, %s1965_s10  ;;  %s2896_s11 = int_to_ptr.vmem [resolvable:$true] %s1663_s11 }
  0x5c   : > { %2198 = vmatpush3.bf16.msra.mxu0 %v2370_v0  ;;  %2285 = vmatpush3.bf16.msra.mxu1 %v2370_v0  ;;  %v2379_v5 = vld [vmem:[%s2746_s19 + $0x80] sm:$0xff]   ;;  %v2375_v7 = vld [vmem:[#allocation6 + $0x28] sm:$0xff]   ;;  %v2376_v8 = vld [vmem:[#allocation6 + $0x30] sm:$0xff]   ;;  %s1649_s25 = scalar_lea.sflag [#allocation5], %s2740_s30  ;;  %s2468_s8 = scalar_lea.vmem %s2896_s11, 4096 }
  0x5d   : > { %2199 = vmatprep.subr.bf16.mxu0 %v2371_v1  ;;  %2278 = vmatprep.subr.bf16.mxu1 %v2371_v1  ;;  %v2374_v6 = vld [vmem:[#allocation6 + $0x20] sm:$0xff]   ;;  %v2377_v9 = vld [vmem:[#allocation6 + $0x38] sm:$0xff]   ;;  %v2380_v10 = vld [vmem:[%s2746_s19 + $0x8] sm:$0xff]   ;;  %p2469_p4 = scmp.ne.s32.totalorder %s2896_s11, %s2468_s8  ;;  %s2560_s26 = smov [#allocation8]  }
  0x5e   : > { %2213 = vmatprep.mubr.bf16.mxu0 %v2378_v4  ;;  %2245 = vmatprep.mubr.bf16.mxu1 %v2379_v5  ;;  %v2381_v11 = vld [vmem:[%s2746_s19 + $0x88] sm:$0xff]   ;;  %v2382_v12 = vld [vmem:[%s2746_s19 + $0x10] sm:$0xff]   ;;  %v2384_v14 = vld [vmem:[%s2746_s19 + $0x18] sm:$0xff]   ;;  %s2472_s21 = sshll.u32 %s2560_s26, 4  ;;  %s2473_s21 = int_to_ptr.vmem [resolvable:$false] %s2472_s21 }
  0x5f   : > { %v2383_v13 = vld [vmem:[%s2746_s19 + $0x90] sm:$0xff]   ;;  %v2385_v15 = vld [vmem:[%s2746_s19 + $0x98] sm:$0xff]   ;;  %v2386_v16 = vld [vmem:[%s2746_s19 + $0x20] sm:$0xff]   ;;  %p2470_p6 = pnand %p2469_p4, %p2681_p11  ;;  %s2474_s4 = scalar_lea.vmem %s2473_s21, 8192 }
  0x60   : > { %2200 = vmatpush3.bf16.msra.mxu0 %v2371_v1  ;;  %2286 = vmatpush3.bf16.msra.mxu1 %v2371_v1  ;;  %v2387_v17 = vld [vmem:[%s2746_s19 + $0xa0] sm:$0xff]   ;;  %v2388_v18 = vld [vmem:[%s2746_s19 + $0x28] sm:$0xff]   ;;  %v2390_v20 = vld [vmem:[%s2746_s19 + $0x30] sm:$0xff]   ;;  %p2475_p12 = scmp.lt.s32.totalorder %s2896_s11, %s2473_s21  ;;  %p2476_p10 = scmp.lt.s32.totalorder %s2474_s4, %s2468_s8 }
  0x61   : > { %2201 = vmatprep.subr.bf16.mxu0 %v2372_v2  ;;  %2279 = vmatprep.subr.bf16.mxu1 %v2372_v2  ;;  %v2389_v19 = vld [vmem:[%s2746_s19 + $0xa8] sm:$0xff]   ;;  %v2391_v21 = vld [vmem:[%s2746_s19 + $0xb0] sm:$0xff]   ;;  %v2392_v22 = vld [vmem:[%s2746_s19 + $0x38] sm:$0xff]   ;;  %p2471_p8 = pneg %p2470_p6 }
  0x62   : > { %v2393_v23 = vld [vmem:[%s2746_s19 + $0xb8] sm:$0xff]   ;;  %v2394_v24 = vld [vmem:[%s2746_s19 + $0x40] sm:$0xff]   ;;  %v2396_v26 = vld [vmem:[%s2746_s19 + $0x48] sm:$0xff]   ;;  %p2477_p0 = por %p2476_p10, %p2475_p12 }
  0x63   : > { %v2395_v25 = vld [vmem:[%s2746_s19 + $0xc0] sm:$0xff]   ;;  %v2397_v27 = vld [vmem:[%s2746_s19 + $0xc8] sm:$0xff]   ;;  %v2398_v28 = vld [vmem:[%s2746_s19 + $0x50] sm:$0xff]  }
  0x64   : > { %2202 = vmatpush3.bf16.msra.mxu0 %v2372_v2  ;;  %2287 = vmatpush3.bf16.msra.mxu1 %v2372_v2  ;;  %v2399_v29 = vld [vmem:[%s2746_s19 + $0xd0] sm:$0xff]   ;;  %v2400_v30 = vld [vmem:[%s2746_s19 + $0x58] sm:$0xff]   ;;  %v2402_v32 = vld [vmem:[%s2746_s19 + $0x60] sm:$0xff]   ;;  %p2478_p5 = pnand %p2477_p0, %p2471_p8 }
  0x65   : > { %2203 = vmatprep.subr.bf16.mxu0 %v2373_v3  ;;  %2280 = vmatprep.subr.bf16.mxu1 %v2373_v3  ;;  %v2401_v31 = vld [vmem:[%s2746_s19 + $0xd8] sm:$0xff]   ;;  %v2403_v33 = vld [vmem:[%s2746_s19 + $0xe0] sm:$0xff]   ;;  %v2404_v34 = vld [vmem:[%s2746_s19 + $0x68] sm:$0xff]  }
  0x66   : > { %v2405_v35 = vld [vmem:[%s2746_s19 + $0xe8] sm:$0xff]   ;;  %v2406_v36 = vld [vmem:[%s2746_s19 + $0x70] sm:$0xff]   ;;  %v2408_v38 = vld [vmem:[%s2746_s19 + $0x78] sm:$0xff]  }
  0x67   : > { %v2407_v37 = vld [vmem:[%s2746_s19 + $0xf0] sm:$0xff]   ;;  %v2409_v39 = vld [vmem:[%s2746_s19 + $0xf8] sm:$0xff]   ;;  %v2791_v40 = vld [vmem:[%s2950_s2] ss:$0 sm:$0xff] }
  0x68   : > { %2204 = vmatpush3.bf16.msra.mxu0 %v2373_v3  ;;  %2288 = vmatpush3.bf16.msra.mxu1 %v2373_v3 }
  0x69   : > { %2205 = vmatprep.subr.bf16.mxu0 %v2374_v6  ;;  %2281 = vmatprep.subr.bf16.mxu1 %v2374_v6 }
  0x6c   : > { %2206 = vmatpush3.bf16.msra.mxu0 %v2374_v6  ;;  %2289 = vmatpush3.bf16.msra.mxu1 %v2374_v6 }
  0x6d   : > { %2207 = vmatprep.subr.bf16.mxu0 %v2375_v7  ;;  %2282 = vmatprep.subr.bf16.mxu1 %v2375_v7 }
  0x70   : > { %2208 = vmatpush3.bf16.msra.mxu0 %v2375_v7  ;;  %2290 = vmatpush3.bf16.msra.mxu1 %v2375_v7 }
  0x71   : > { %2209 = vmatprep.subr.bf16.mxu0 %v2376_v8  ;;  %2283 = vmatprep.subr.bf16.mxu1 %v2376_v8 }
  0x74   : > { %2210 = vmatpush3.bf16.msra.mxu0 %v2376_v8  ;;  %2291 = vmatpush3.bf16.msra.mxu1 %v2376_v8 }
  0x75   : > { %2211 = vmatprep.subr.bf16.mxu0 %v2377_v9  ;;  %2284 = vmatprep.subr.bf16.mxu1 %v2377_v9 }
  0x78   : > { %2212 = vmatpush3.bf16.msra.mxu0 %v2377_v9  ;;  %2292 = vmatpush3.bf16.msra.mxu1 %v2377_v9 }
  0x7b   : > { %2214 = vmatmul.mubr.bf16.vlgmr.msra.gmra.mrb[0].mxu0 %v2380_v10  ;;  %2246 = vmatmul.mubr.bf16.vlgmr.msra.gmra.mrb[0].mxu1 %v2381_v11 }
  0x7c   : > { %2217 = vmatprep.mubr.bf16.mxu0 %v2382_v12  ;;  %2249 = vmatprep.mubr.bf16.mxu1 %v2383_v13 }
  0x83   : > { %2218 = vmatmul.mubr.bf16.gmra.mrb[4].mxu0 %v2384_v14  ;;  %2250 = vmatmul.mubr.bf16.gmra.mrb[4].mxu1 %v2385_v15 }
  0x84   : > { %2221 = vmatprep.mubr.bf16.mxu0 %v2386_v16  ;;  %2253 = vmatprep.mubr.bf16.mxu1 %v2387_v17 }
  0x8b   : > { %2222 = vmatmul.mubr.bf16.gmra.mrb[8].mxu0 %v2388_v18  ;;  %2254 = vmatmul.mubr.bf16.gmra.mrb[8].mxu1 %v2389_v19 }
  0x8c   : > { %2225 = vmatprep.mubr.bf16.mxu0 %v2390_v20  ;;  %2257 = vmatprep.mubr.bf16.mxu1 %v2391_v21 }
  0x93   : > { %2226 = vmatmul.mubr.bf16.gmra.mrb[12].mxu0 %v2392_v22  ;;  %2258 = vmatmul.mubr.bf16.gmra.mrb[12].mxu1 %v2393_v23 }
  0x94   : > { %2229 = vmatprep.mubr.bf16.mxu0 %v2394_v24  ;;  %2261 = vmatprep.mubr.bf16.mxu1 %v2395_v25 }
  0x9b   : > { %2230 = vmatmul.mubr.bf16.gmra.mrb[16].mxu0 %v2396_v26  ;;  %2262 = vmatmul.mubr.bf16.gmra.mrb[16].mxu1 %v2397_v27 }
  0x9c   : > { %2233 = vmatprep.mubr.bf16.mxu0 %v2398_v28  ;;  %2265 = vmatprep.mubr.bf16.mxu1 %v2399_v29 }
  0xa3   : > { %2234 = vmatmul.mubr.bf16.gmra.mrb[20].mxu0 %v2400_v30  ;;  %2266 = vmatmul.mubr.bf16.gmra.mrb[20].mxu1 %v2401_v31 }
  0xa4   : > { %2237 = vmatprep.mubr.bf16.mxu0 %v2402_v32  ;;  %2269 = vmatprep.mubr.bf16.mxu1 %v2403_v33 }
  0xab   : > { %2238 = vmatmul.mubr.bf16.gmra.mrb[24].mxu0 %v2404_v34  ;;  %2270 = vmatmul.mubr.bf16.gmra.mrb[24].mxu1 %v2405_v35 }
  0xac   : > { %2241 = vmatprep.mubr.bf16.mxu0 %v2406_v36  ;;  %2273 = vmatprep.mubr.bf16.mxu1 %v2407_v37 }
  0xb3   : > { %2242 = vmatmul.mubr.bf16.gmra.mrb[28].mxu0 %v2408_v38  ;;  %2274 = vmatmul.mubr.bf16.gmra.mrb[28].mxu1 %v2409_v39 }
 0x14e   : > { %v2215_v41 = vpop.f32.mrb[0].mxu0  ;;  %v2247_v42 = vpop.f32.mrb[0].mxu1 }
 0x14f   : > { %v1202_v43 = vadd.f32 %v2215_v41, %v2791_v40  ;;  %v1234_v44 = vadd.f32 %v2247_v42, %v2791_v40  ;;  %v743_v45 = vpop.f32.mrb[1].mxu0  ;;  %v871_v46 = vpop.f32.mrb[1].mxu1 }
 0x150   : > { %v1200_v47 = vadd.f32 %v2791_v40, %v743_v45  ;;  %v1232_v48 = vadd.f32 %v2791_v40, %v871_v46  ;;  %v2216_v49 = vpop.f32.mrb[2].mxu0  ;;  %v2248_v50 = vpop.f32.mrb[2].mxu1 }
 0x151   : > { %v1203_v51 = vadd.f32 %v2216_v49, %v2791_v40  ;;  %v1235_v52 = vadd.f32 %v2248_v50, %v2791_v40  ;;  %v746_v53 = vpop.f32.mrb[3].mxu0  ;;  %v874_v54 = vpop.f32.mrb[3].mxu1  ;;  %v1266_v57 = vmax.f32 %v1202_v43, 0.0  ;;  %v1298_v58 = vmax.f32 %v1234_v44, 0.0 }
 0x152   : > { %v1201_v55 = vadd.f32 %v2791_v40, %v746_v53  ;;  %v1233_v56 = vadd.f32 %v2791_v40, %v874_v54  ;;  %v1264_v61 = vmax.f32 %v1200_v47, 0.0  ;;  %v1296_v62 = vmax.f32 %v1232_v48, 0.0 }
 0x153   : > { %v1267_v59 = vmax.f32 %v1203_v51, 0.0  ;;  %v1299_v60 = vmax.f32 %v1235_v52, 0.0 }
 0x154   : > { %v1265_v63 = vmax.f32 %v1201_v55, 0.0  ;;  %v1297_v0 = vmax.f32 %v1233_v56, 0.0 }
 0x155   : > { %v1974_v1 = vpack.c.bf16 %v1267_v59, %v1266_v57  ;;  %v2054_v2 = vpack.c.bf16 %v1299_v60, %v1298_v58 }
 0x156   : > { %v1969_v3 = vpack.c.bf16 %v1265_v63, %v1264_v61  ;;  %v2049_v4 = vpack.c.bf16 %v1297_v0, %v1296_v62  ;;  %v2219_v5 = vpop.f32.mrb[4].mxu0  ;;  %v2251_v6 = vpop.f32.mrb[4].mxu1 }
 0x157   : > { %2126 = vst [vmem:[%s2803_s24 + $0x8] sm:$0xff] %v1974_v1   ;;  %2142 = vst [vmem:[%s2803_s24 + $0x88] sm:$0xff] %v2054_v2   ;;  %v1206_v7 = vadd.f32 %v2219_v5, %v2791_v40  ;;  %v1238_v8 = vadd.f32 %v2251_v6, %v2791_v40  ;;  %v759_v9 = vpop.f32.mrb[5].mxu0  ;;  %v887_v10 = vpop.f32.mrb[5].mxu1 }
 0x158   : > { %1970 = vst [vmem:[%s2803_s24] sm:$0xff] %v1969_v3   ;;  %2141 = vst [vmem:[%s2803_s24 + $0x80] sm:$0xff] %v2049_v4   ;;  %v1204_v11 = vadd.f32 %v2791_v40, %v759_v9  ;;  %v1236_v12 = vadd.f32 %v2791_v40, %v887_v10  ;;  %v2220_v13 = vpop.f32.mrb[6].mxu0  ;;  %v2252_v14 = vpop.f32.mrb[6].mxu1 }
 0x159   : > { %v1207_v15 = vadd.f32 %v2220_v13, %v2791_v40  ;;  %v1239_v16 = vadd.f32 %v2252_v14, %v2791_v40  ;;  %v762_v17 = vpop.f32.mrb[7].mxu0  ;;  %v890_v18 = vpop.f32.mrb[7].mxu1  ;;  %v1270_v21 = vmax.f32 %v1206_v7, 0.0  ;;  %v1302_v22 = vmax.f32 %v1238_v8, 0.0 }
 0x15a   : > { %v1205_v19 = vadd.f32 %v2791_v40, %v762_v17  ;;  %v1237_v20 = vadd.f32 %v2791_v40, %v890_v18  ;;  %v1268_v25 = vmax.f32 %v1204_v11, 0.0  ;;  %v1300_v26 = vmax.f32 %v1236_v12, 0.0 }
 0x15b   : > { %v1271_v23 = vmax.f32 %v1207_v15, 0.0  ;;  %v1303_v24 = vmax.f32 %v1239_v16, 0.0 }
 0x15c   : > { %v1269_v27 = vmax.f32 %v1205_v19, 0.0  ;;  %v1301_v28 = vmax.f32 %v1237_v20, 0.0 }
 0x15d   : > { %v1984_v29 = vpack.c.bf16 %v1271_v23, %v1270_v21  ;;  %v2064_v30 = vpack.c.bf16 %v1303_v24, %v1302_v22 }
 0x15e   : > { %v1979_v31 = vpack.c.bf16 %v1269_v27, %v1268_v25  ;;  %v2059_v32 = vpack.c.bf16 %v1301_v28, %v1300_v26  ;;  %v2223_v33 = vpop.f32.mrb[8].mxu0  ;;  %v2255_v34 = vpop.f32.mrb[8].mxu1 }
 0x15f   : > { %2128 = vst [vmem:[%s2803_s24 + $0x18] sm:$0xff] %v1984_v29   ;;  %2144 = vst [vmem:[%s2803_s24 + $0x98] sm:$0xff] %v2064_v30   ;;  %v1210_v35 = vadd.f32 %v2223_v33, %v2791_v40  ;;  %v1242_v36 = vadd.f32 %v2255_v34, %v2791_v40  ;;  %v775_v37 = vpop.f32.mrb[9].mxu0  ;;  %v903_v38 = vpop.f32.mrb[9].mxu1 }
 0x160   : > { %2127 = vst [vmem:[%s2803_s24 + $0x10] sm:$0xff] %v1979_v31   ;;  %2143 = vst [vmem:[%s2803_s24 + $0x90] sm:$0xff] %v2059_v32   ;;  %v1208_v39 = vadd.f32 %v2791_v40, %v775_v37  ;;  %v1240_v41 = vadd.f32 %v2791_v40, %v903_v38  ;;  %v2224_v42 = vpop.f32.mrb[10].mxu0  ;;  %v2256_v43 = vpop.f32.mrb[10].mxu1 }
 0x161   : > { %v1211_v44 = vadd.f32 %v2224_v42, %v2791_v40  ;;  %v1243_v45 = vadd.f32 %v2256_v43, %v2791_v40  ;;  %v778_v46 = vpop.f32.mrb[11].mxu0  ;;  %v906_v47 = vpop.f32.mrb[11].mxu1  ;;  %v1274_v50 = vmax.f32 %v1210_v35, 0.0  ;;  %v1306_v51 = vmax.f32 %v1242_v36, 0.0 }
 0x162   : > { %v1209_v48 = vadd.f32 %v2791_v40, %v778_v46  ;;  %v1241_v49 = vadd.f32 %v2791_v40, %v906_v47  ;;  %v1272_v54 = vmax.f32 %v1208_v39, 0.0  ;;  %v1304_v55 = vmax.f32 %v1240_v41, 0.0 }
 0x163   : > { %v1275_v52 = vmax.f32 %v1211_v44, 0.0  ;;  %v1307_v53 = vmax.f32 %v1243_v45, 0.0 }
 0x164   : > { %v1273_v56 = vmax.f32 %v1209_v48, 0.0  ;;  %v1305_v57 = vmax.f32 %v1241_v49, 0.0 }
 0x165   : > { %v1994_v58 = vpack.c.bf16 %v1275_v52, %v1274_v50  ;;  %v2074_v59 = vpack.c.bf16 %v1307_v53, %v1306_v51 }
 0x166   : > { %v1989_v60 = vpack.c.bf16 %v1273_v56, %v1272_v54  ;;  %v2069_v61 = vpack.c.bf16 %v1305_v57, %v1304_v55  ;;  %v2227_v62 = vpop.f32.mrb[12].mxu0  ;;  %v2259_v63 = vpop.f32.mrb[12].mxu1 }
 0x167   : > { %2130 = vst [vmem:[%s2803_s24 + $0x28] sm:$0xff] %v1994_v58   ;;  %2146 = vst [vmem:[%s2803_s24 + $0xa8] sm:$0xff] %v2074_v59   ;;  %v1214_v0 = vadd.f32 %v2227_v62, %v2791_v40  ;;  %v1246_v1 = vadd.f32 %v2259_v63, %v2791_v40  ;;  %v791_v2 = vpop.f32.mrb[13].mxu0  ;;  %v919_v3 = vpop.f32.mrb[13].mxu1 }
 0x168   : > { %2129 = vst [vmem:[%s2803_s24 + $0x20] sm:$0xff] %v1989_v60   ;;  %2145 = vst [vmem:[%s2803_s24 + $0xa0] sm:$0xff] %v2069_v61   ;;  %v1212_v4 = vadd.f32 %v2791_v40, %v791_v2  ;;  %v1244_v5 = vadd.f32 %v2791_v40, %v919_v3  ;;  %v2228_v6 = vpop.f32.mrb[14].mxu0  ;;  %v2260_v7 = vpop.f32.mrb[14].mxu1 }
 0x169   : > { %v1215_v8 = vadd.f32 %v2228_v6, %v2791_v40  ;;  %v1247_v9 = vadd.f32 %v2260_v7, %v2791_v40  ;;  %v794_v10 = vpop.f32.mrb[15].mxu0  ;;  %v922_v11 = vpop.f32.mrb[15].mxu1  ;;  %v1278_v14 = vmax.f32 %v1214_v0, 0.0  ;;  %v1310_v15 = vmax.f32 %v1246_v1, 0.0 }
 0x16a   : > { %v1213_v12 = vadd.f32 %v2791_v40, %v794_v10  ;;  %v1245_v13 = vadd.f32 %v2791_v40, %v922_v11  ;;  %v1276_v18 = vmax.f32 %v1212_v4, 0.0  ;;  %v1308_v19 = vmax.f32 %v1244_v5, 0.0 }
 0x16b   : > { %v1279_v16 = vmax.f32 %v1215_v8, 0.0  ;;  %v1311_v17 = vmax.f32 %v1247_v9, 0.0 }
 0x16c   : > { %v1277_v20 = vmax.f32 %v1213_v12, 0.0  ;;  %v1309_v21 = vmax.f32 %v1245_v13, 0.0 }
 0x16d   : > { %v2004_v22 = vpack.c.bf16 %v1279_v16, %v1278_v14  ;;  %v2084_v23 = vpack.c.bf16 %v1311_v17, %v1310_v15 }
 0x16e   : > { %v1999_v24 = vpack.c.bf16 %v1277_v20, %v1276_v18  ;;  %v2079_v25 = vpack.c.bf16 %v1309_v21, %v1308_v19  ;;  %v2231_v26 = vpop.f32.mrb[16].mxu0  ;;  %v2263_v27 = vpop.f32.mrb[16].mxu1 }
 0x16f   : > { %2132 = vst [vmem:[%s2803_s24 + $0x38] sm:$0xff] %v2004_v22   ;;  %2148 = vst [vmem:[%s2803_s24 + $0xb8] sm:$0xff] %v2084_v23   ;;  %v1218_v28 = vadd.f32 %v2231_v26, %v2791_v40  ;;  %v1250_v29 = vadd.f32 %v2263_v27, %v2791_v40  ;;  %v807_v30 = vpop.f32.mrb[17].mxu0  ;;  %v935_v31 = vpop.f32.mrb[17].mxu1 }
 0x170   : > { %2131 = vst [vmem:[%s2803_s24 + $0x30] sm:$0xff] %v1999_v24   ;;  %2147 = vst [vmem:[%s2803_s24 + $0xb0] sm:$0xff] %v2079_v25   ;;  %v1216_v32 = vadd.f32 %v2791_v40, %v807_v30  ;;  %v1248_v33 = vadd.f32 %v2791_v40, %v935_v31  ;;  %v2232_v34 = vpop.f32.mrb[18].mxu0  ;;  %v2264_v35 = vpop.f32.mrb[18].mxu1 }
 0x171   : > { %v1219_v36 = vadd.f32 %v2232_v34, %v2791_v40  ;;  %v1251_v37 = vadd.f32 %v2264_v35, %v2791_v40  ;;  %v810_v38 = vpop.f32.mrb[19].mxu0  ;;  %v938_v39 = vpop.f32.mrb[19].mxu1  ;;  %v1282_v43 = vmax.f32 %v1218_v28, 0.0  ;;  %v1314_v44 = vmax.f32 %v1250_v29, 0.0 }
 0x172   : > { %v1217_v41 = vadd.f32 %v2791_v40, %v810_v38  ;;  %v1249_v42 = vadd.f32 %v2791_v40, %v938_v39  ;;  %v1280_v47 = vmax.f32 %v1216_v32, 0.0  ;;  %v1312_v48 = vmax.f32 %v1248_v33, 0.0 }
 0x173   : > { %v1283_v45 = vmax.f32 %v1219_v36, 0.0  ;;  %v1315_v46 = vmax.f32 %v1251_v37, 0.0 }
 0x174   : > { %v1281_v49 = vmax.f32 %v1217_v41, 0.0  ;;  %v1313_v50 = vmax.f32 %v1249_v42, 0.0 }
 0x175   : > { %v2014_v51 = vpack.c.bf16 %v1283_v45, %v1282_v43  ;;  %v2094_v52 = vpack.c.bf16 %v1315_v46, %v1314_v44 }
 0x176   : > { %v2009_v53 = vpack.c.bf16 %v1281_v49, %v1280_v47  ;;  %v2089_v54 = vpack.c.bf16 %v1313_v50, %v1312_v48  ;;  %v2235_v55 = vpop.f32.mrb[20].mxu0  ;;  %v2267_v56 = vpop.f32.mrb[20].mxu1 }
 0x177   : > { %2134 = vst [vmem:[%s2803_s24 + $0x48] sm:$0xff] %v2014_v51   ;;  %2150 = vst [vmem:[%s2803_s24 + $0xc8] sm:$0xff] %v2094_v52   ;;  %v1222_v57 = vadd.f32 %v2235_v55, %v2791_v40  ;;  %v1254_v58 = vadd.f32 %v2267_v56, %v2791_v40  ;;  %v823_v59 = vpop.f32.mrb[21].mxu0  ;;  %v951_v60 = vpop.f32.mrb[21].mxu1 }
 0x178   : > { %2133 = vst [vmem:[%s2803_s24 + $0x40] sm:$0xff] %v2009_v53   ;;  %2149 = vst [vmem:[%s2803_s24 + $0xc0] sm:$0xff] %v2089_v54   ;;  %v1220_v61 = vadd.f32 %v2791_v40, %v823_v59  ;;  %v1252_v62 = vadd.f32 %v2791_v40, %v951_v60  ;;  %v2236_v63 = vpop.f32.mrb[22].mxu0  ;;  %v2268_v0 = vpop.f32.mrb[22].mxu1 }
 0x179   : > { %v1223_v1 = vadd.f32 %v2236_v63, %v2791_v40  ;;  %v1255_v2 = vadd.f32 %v2268_v0, %v2791_v40  ;;  %v826_v3 = vpop.f32.mrb[23].mxu0  ;;  %v954_v4 = vpop.f32.mrb[23].mxu1  ;;  %v1286_v7 = vmax.f32 %v1222_v57, 0.0  ;;  %v1318_v8 = vmax.f32 %v1254_v58, 0.0 }
 0x17a   : > { %v1221_v5 = vadd.f32 %v2791_v40, %v826_v3  ;;  %v1253_v6 = vadd.f32 %v2791_v40, %v954_v4  ;;  %v1284_v11 = vmax.f32 %v1220_v61, 0.0  ;;  %v1316_v12 = vmax.f32 %v1252_v62, 0.0 }
 0x17b   : > { %v1287_v9 = vmax.f32 %v1223_v1, 0.0  ;;  %v1319_v10 = vmax.f32 %v1255_v2, 0.0 }
 0x17c   : > { %v1285_v13 = vmax.f32 %v1221_v5, 0.0  ;;  %v1317_v14 = vmax.f32 %v1253_v6, 0.0 }
 0x17d   : > { %v2024_v15 = vpack.c.bf16 %v1287_v9, %v1286_v7  ;;  %v2104_v16 = vpack.c.bf16 %v1319_v10, %v1318_v8 }
 0x17e   : > { %v2019_v17 = vpack.c.bf16 %v1285_v13, %v1284_v11  ;;  %v2099_v18 = vpack.c.bf16 %v1317_v14, %v1316_v12  ;;  %v2239_v19 = vpop.f32.mrb[24].mxu0  ;;  %v2271_v20 = vpop.f32.mrb[24].mxu1 }
 0x17f   : > { %2136 = vst [vmem:[%s2803_s24 + $0x58] sm:$0xff] %v2024_v15   ;;  %2152 = vst [vmem:[%s2803_s24 + $0xd8] sm:$0xff] %v2104_v16   ;;  %v1226_v21 = vadd.f32 %v2239_v19, %v2791_v40  ;;  %v1258_v22 = vadd.f32 %v2271_v20, %v2791_v40  ;;  %v839_v23 = vpop.f32.mrb[25].mxu0  ;;  %v967_v24 = vpop.f32.mrb[25].mxu1 }
 0x180   : > { %2135 = vst [vmem:[%s2803_s24 + $0x50] sm:$0xff] %v2019_v17   ;;  %2151 = vst [vmem:[%s2803_s24 + $0xd0] sm:$0xff] %v2099_v18   ;;  %v1224_v25 = vadd.f32 %v2791_v40, %v839_v23  ;;  %v1256_v26 = vadd.f32 %v2791_v40, %v967_v24  ;;  %v2240_v27 = vpop.f32.mrb[26].mxu0  ;;  %v2272_v28 = vpop.f32.mrb[26].mxu1 }
 0x181   : > { %v1227_v29 = vadd.f32 %v2240_v27, %v2791_v40  ;;  %v1259_v30 = vadd.f32 %v2272_v28, %v2791_v40  ;;  %v842_v31 = vpop.f32.mrb[27].mxu0  ;;  %v970_v32 = vpop.f32.mrb[27].mxu1  ;;  %v1290_v35 = vmax.f32 %v1226_v21, 0.0  ;;  %v1322_v36 = vmax.f32 %v1258_v22, 0.0 }
 0x182   : > { %v1225_v33 = vadd.f32 %v2791_v40, %v842_v31  ;;  %v1257_v34 = vadd.f32 %v2791_v40, %v970_v32  ;;  %v1288_v39 = vmax.f32 %v1224_v25, 0.0  ;;  %v1320_v41 = vmax.f32 %v1256_v26, 0.0 }
 0x183   : > { %v1291_v37 = vmax.f32 %v1227_v29, 0.0  ;;  %v1323_v38 = vmax.f32 %v1259_v30, 0.0 }
 0x184   : > { %v1289_v42 = vmax.f32 %v1225_v33, 0.0  ;;  %v1321_v43 = vmax.f32 %v1257_v34, 0.0 }
 0x185   : > { %v2034_v44 = vpack.c.bf16 %v1291_v37, %v1290_v35  ;;  %v2114_v45 = vpack.c.bf16 %v1323_v38, %v1322_v36 }
 0x186   : > { %v2029_v46 = vpack.c.bf16 %v1289_v42, %v1288_v39  ;;  %v2109_v47 = vpack.c.bf16 %v1321_v43, %v1320_v41  ;;  %v2243_v48 = vpop.f32.mrb[28].mxu0  ;;  %v2275_v49 = vpop.f32.mrb[28].mxu1 }
 0x187   : > { %2138 = vst [vmem:[%s2803_s24 + $0x68] sm:$0xff] %v2034_v44   ;;  %2154 = vst [vmem:[%s2803_s24 + $0xe8] sm:$0xff] %v2114_v45   ;;  %v1230_v50 = vadd.f32 %v2243_v48, %v2791_v40  ;;  %v1262_v51 = vadd.f32 %v2275_v49, %v2791_v40  ;;  %v855_v52 = vpop.f32.mrb[29].mxu0  ;;  %v983_v53 = vpop.f32.mrb[29].mxu1 }
 0x188   : > { %2137 = vst [vmem:[%s2803_s24 + $0x60] sm:$0xff] %v2029_v46   ;;  %2153 = vst [vmem:[%s2803_s24 + $0xe0] sm:$0xff] %v2109_v47   ;;  %v1228_v54 = vadd.f32 %v2791_v40, %v855_v52  ;;  %v1260_v55 = vadd.f32 %v2791_v40, %v983_v53  ;;  %v2244_v56 = vpop.f32.mrb[30].mxu0  ;;  %v2276_v57 = vpop.f32.mrb[30].mxu1 }
 0x189   : > { %v1231_v58 = vadd.f32 %v2244_v56, %v2791_v40  ;;  %v1263_v59 = vadd.f32 %v2276_v57, %v2791_v40  ;;  %v858_v60 = vpop.f32.mrb[31].mxu0  ;;  %v986_v61 = vpop.f32.mrb[31].mxu1  ;;  %v1294_v0 = vmax.f32 %v1230_v50, 0.0  ;;  %v1326_v1 = vmax.f32 %v1262_v51, 0.0 }
 0x18a   : > { %v1229_v62 = vadd.f32 %v2791_v40, %v858_v60  ;;  %v1261_v63 = vadd.f32 %v2791_v40, %v986_v61  ;;  %v1292_v4 = vmax.f32 %v1228_v54, 0.0  ;;  %v1324_v5 = vmax.f32 %v1260_v55, 0.0 }
 0x18b   : > { %v1295_v2 = vmax.f32 %v1231_v58, 0.0  ;;  %v1327_v3 = vmax.f32 %v1263_v59, 0.0 }
 0x18c   : > { %v1293_v6 = vmax.f32 %v1229_v62, 0.0  ;;  %v1325_v7 = vmax.f32 %v1261_v63, 0.0 }
 0x18d   : > { %v2044_v8 = vpack.c.bf16 %v1295_v2, %v1294_v0  ;;  %v2124_v9 = vpack.c.bf16 %v1327_v3, %v1326_v1 }
 0x18e   : > { %v2039_v40 = vpack.c.bf16 %v1293_v6, %v1292_v4  ;;  %v2119_v10 = vpack.c.bf16 %v1325_v7, %v1324_v5 }
 0x18f   : > { %2140 = vst [vmem:[%s2803_s24 + $0x78] sm:$0xff] %v2044_v8   ;;  %2156 = vst [vmem:[%s2803_s24 + $0xf8] sm:$0xff] %v2124_v9  }
 0x190   : > { %2139 = vst [vmem:[%s2803_s24 + $0x70] sm:$0xff] %v2039_v40   ;;  %2155 = vst [vmem:[%s2803_s24 + $0xf0] sm:$0xff] %v2119_v10  }
 0x191   : > { %2481 = shalt.err (!%p2478_p5)
}
 0x192   : > { %s2482_s6 = scalar_lea.hbm %s2894_s15, 4096  ;;  %s2486_s19 = scalar_lea.hbm %s2951_s3, 16384 }
 0x193   : > { %p2483_p9 = scmp.ne.s32.totalorder %s2894_s15, %s2482_s6  ;;  %p2487_p3 = scmp.lt.u32.totalorder %s2894_s15, %s2951_s3 }
 0x194   : > { %p2488_p7 = scmp.lt.u32.totalorder %s2486_s19, %s2482_s6  ;;  %p2490_p4 = scmp.lt.u32.totalorder %s2482_s6, %s2894_s15 }
 0x195   : > { %p2484_p1 = pnand %p2483_p9, %p2681_p11 }
 0x196   : > { %p2489_p13 = por %p2488_p7, %p2487_p3 }
 0x197   : > { %p2485_p2 = pneg %p2484_p1 }
 0x198   : > { %p2491_p6 = por %p2490_p4, %p2489_p13 }
 0x19a   : > { %p2492_p8 = pnand %p2491_p6, %p2485_p2 }
 0x19c   : > { %2495 = shalt.err (!%p2492_p8)
}
 0x19d   : > { %s2561_s24 = smov 64   ;;  %s2562_s10 = smov 4  }
 0x19e   : > { %2299 = dma.vmem_to_hbm [thread:$0]  (%p2681_p11), %s2896_s11, 4096, %s2894_s15, %s1649_s25, %s2561_s24, %s2561_s24, %s2562_s10  }
 0x19f PF: > { %p2316_p12 = scmp.ge.s32.totalorder %s2554_s17, 2  ;;  %s1678_s9 = sand.u32 1, %s2534_s12  }
 0x1a0   : > { %p2969_p10 = scmp.ne.s32.totalorder %s2959_s23, 0  ;;  %s1679_s18 = scalar_lea.sflag [#allocation5], %s1678_s9 }
 0x1a2   : > { %p2310_p0 = pnand %p2316_p12, %p2969_p10 }
 0x1a4   : > { %2529 = dma.done.wait (!%p2310_p0), %s1679_s18, 4096  }
 0x1a5   : > { %2531 = vsyncadd (!%p2310_p0), %s1679_s18, 4294963200  ;;  %s20_s17 = sadd.s32 1, %s2554_s17   ;;  %s2970_s12 = smov %s2538_s13 }
 0x1a6   : > { %p17_p5 = scmp.ge.s32.totalorder %s20_s17, 6   ;;  %s2971_s13 = smov %s2542_s14 }
 0x1a7   : > { %s2972_s14 = smov %s2690_s5  ;;  %s2973_s15 = smov %s2550_s16 }
 0x1a8   : > { %s2974_s16 = smov %s2976_s28  ;;  %19 = sbr.rel (!%p17_p5) target bundleno = 7 (0x7), region = 93 }
 0x1af   :  { %1684 = vsyncpa [#allocation4], 1 }
 0x1b0   :  { %1686 = vsyncpa [#allocation4 + $0x1], 1 }
 0x1b1   :  { %1687 = vsyncpa [#allocation7], 1 }
 0x1b2   :  { %1688 = vsyncpa [#allocation5], 1 }
 0x1b3   :  { %1690 = vsyncpa [#allocation5 + $0x1], 1 }

</bundles_post_ra>
